<compile_context>
chip_gen: v5e
topology: v5e:2x2
jax: 0.10.0
libtpu: 0.0.40
codegen_flags: <defaults>
</compile_context>

<pallas_src>
import functools

import jax
import jax.numpy as jnp
from jax.experimental import pallas as pl
from jax.experimental.pallas import tpu as pltpu


# ----------------------------- Pallas kernel --------------------------------
def _freq_mix_kernel(x_ref, w_ref, b_ref, y_ref):
    """Per-pixel channel mix of the rFFT planes (== the 1x1 conv).

    x_ref: (1, 2C, tm)  input planes, rows = [real(C); imag(C)], lanes = pixels
    w_ref: (2C, 2C)     permuted weight (rows/cols de-interleaved)
    b_ref: (2C, 1)      permuted bias
    y_ref: (1, 2C, tm)  output planes, rows = [real outs(C); imag outs(C)]
    """
    x = x_ref[0]                                               # (2C, tm)
    y = (jnp.dot(w_ref[...], x, preferred_element_type=jnp.float32)
         + b_ref[...])                                         # (2C, tm) f32
    y_ref[0] = y.astype(y_ref.dtype)


def conv1x1_freq_mix(x_ri, w_perm, b_perm, *, tm_max=2048):
    """Channel-major 1x1 conv over frequency-domain pixels.

    x_ri  : (B, 2C, M)  rows [real planes; imag planes], M = H * Wr (lane axis)
    w_perm: (2C, 2C)    de-interleaved weight
    b_perm: (2C, 1)     de-interleaved bias
    returns (B, 2C, M)  rows [real outs; imag outs]
    """
    B, C2, M = x_ri.shape

    # Full row if it fits (block dim == full array dim is always legal), else a
    # lane-aligned 2048-wide tile; the ragged last block is masked by Pallas.
    tm = M if M <= tm_max else tm_max
    grid = (B, pl.cdiv(M, tm))

    return pl.pallas_call(
        _freq_mix_kernel,
        out_shape=jax.ShapeDtypeStruct((B, C2, M), x_ri.dtype),
        grid_spec=pltpu.PrefetchScalarGridSpec(
            num_scalar_prefetch=0,
            grid=grid,
            in_specs=[
                pl.BlockSpec((1, C2, tm), lambda b, m: (b, 0, m)),   # x
                pl.BlockSpec((C2, C2), lambda b, m: (0, 0)),         # W_perm
                pl.BlockSpec((C2, 1), lambda b, m: (0, 0)),          # bias
            ],
            out_specs=pl.BlockSpec((1, C2, tm), lambda b, m: (b, 0, m)),
        ),
        compiler_params=pltpu.CompilerParams(
            dimension_semantics=("parallel", "parallel"),
        ),
    )(x_ri, w_perm, b_perm)


# --------------------------- Full forward pass -------------------------------
@functools.partial(jax.jit, static_argnames=("fft_norm",))
def simplified_fourier_block(x, conv_weight, conv_bias, fft_norm="ortho"):
    """x: (B, C, H, W) f32.  conv_weight: (2C, 2C, 1, 1), conv_bias: (2C,)."""
    B, C, H, W = x.shape

    # 1) rfft over spatial dims.
    # TODO(synk): rfft2 / irfft2 have no Pallas equivalent; they stay in XLA.
    ffted = jnp.fft.rfft2(x, axes=(-2, -1), norm=fft_norm)     # (B, C, H, Wr) c64
    Wr = ffted.shape[-1]
    M = H * Wr

    # 2) Real/imag planes stacked on the channel axis (NOT interleaved), pixels
    #    flattened onto the last (lane) axis.  No transposes in the wrapper and
    #    no interleaved tensor is ever materialized in HBM.
    xr = jnp.real(ffted).reshape(B, C, M)
    xi = jnp.imag(ffted).reshape(B, C, M)
    x_ri = jnp.concatenate([xr, xi], axis=1)                   # (B, 2C, M)

    # 3) Fold the PyTorch real/imag channel interleave into a static permutation
    #    of the (2C, 2C) weight.  PyTorch channel 2c -> real of c, 2c+1 -> imag.
    w = conv_weight.reshape(2 * C, 2 * C)
    w_rows = jnp.concatenate([w[0::2], w[1::2]], axis=0)       # rows: [real outs; imag outs]
    w_perm = jnp.concatenate([w_rows[:, 0::2], w_rows[:, 1::2]], axis=1)
    b_perm = jnp.concatenate(
        [conv_bias[0::2], conv_bias[1::2]]).reshape(2 * C, 1)

    # 4) Pallas kernel: per-pixel channel mix (the 1x1 conv), single fused dot.
    y = conv1x1_freq_mix(x_ri, w_perm, b_perm)                 # (B, 2C, M)

    # 5) back to complex and inverse rfft.
    yr = y[:, :C].reshape(B, C, H, Wr)
    yi = y[:, C:].reshape(B, C, H, Wr)
    cplx = jax.lax.complex(yr, yi)
    out = jnp.fft.irfft2(cplx, s=(H, W), axes=(-2, -1), norm=fft_norm)
    return out.astype(x.dtype)


# ------------------------------- Reference -----------------------------------
def _reference(x, conv_weight, conv_bias, fft_norm="ortho"):
    B, C, H, W = x.shape
    ffted = jnp.fft.rfft2(x, axes=(-2, -1), norm=fft_norm)
    stacked = jnp.stack((jnp.real(ffted), jnp.imag(ffted)), axis=2)
    chans = stacked.reshape(B, 2 * C, H, ffted.shape[-1])
    wm = conv_weight.reshape(2 * C, 2 * C)
    y = jnp.einsum("oc,bchw->bohw", wm, chans) + conv_bias[None, :, None, None]
    y = y.reshape(B, C, 2, H, ffted.shape[-1])
    cplx = jax.lax.complex(y[:, :, 0], y[:, :, 1])
    return jnp.fft.irfft2(cplx, s=(H, W), axes=(-2, -1), norm=fft_norm)


if __name__ == "__main__":
    key = jax.random.PRNGKey(0)
    B, C, H, W = 2, 4, 16, 16

    kx, kw, kb = jax.random.split(key, 3)
    x = jax.random.normal(kx, (B, C, H, W), dtype=jnp.float32)

    # Deterministic Conv2d(2C -> 2C, 1x1) parameter init (uniform, kaiming-like bound)
    fan_in = 2 * C  # 1x1 kernel
    bound = 1.0 / jnp.sqrt(fan_in)
    conv_weight = jax.random.uniform(
        kw, (2 * C, 2 * C, 1, 1), dtype=jnp.float32, minval=-bound, maxval=bound
    )
    conv_bias = jax.random.uniform(
        kb, (2 * C,), dtype=jnp.float32, minval=-bound, maxval=bound
    )

    out = simplified_fourier_block(x, conv_weight, conv_bias)
    out = jax.block_until_ready(out)

    ref = _reference(x, conv_weight, conv_bias)
    assert out.shape == (B, C, H, W)
    assert jnp.allclose(out, ref, atol=1e-4, rtol=1e-4), "mismatch vs reference"

    print("KERNEL_OK")
</pallas_src>

<mosaic_0001>
module attributes {stable_mosaic.version = 11 : i64} {
  func.func @_freq_mix_kernel(%arg0: i32, %arg1: i32, %arg2: memref<1x8x144xf32, #tpu.memory_space<vmem>>, %arg3: memref<8x8xf32, #tpu.memory_space<vmem>>, %arg4: memref<8x1xf32, #tpu.memory_space<vmem>>, %arg5: memref<1x8x144xf32, #tpu.memory_space<vmem>>) attributes {dimension_semantics = [#tpu.dimension_semantics<parallel>, #tpu.dimension_semantics<parallel>], iteration_bounds = array<i64: 2, 1>, scalar_prefetch = 0 : i64, scratch_operands = 0 : i64, tpu.core_type = #tpu.core_type<tc>, window_params = [{transform_indices = @transform_0, window_bounds = array<i64: 1, 8, 144>}, {pipeline_mode = #tpu.pipeline_mode<synchronous>, transform_indices = @transform_1, window_bounds = array<i64: 8, 8>}, {pipeline_mode = #tpu.pipeline_mode<synchronous>, transform_indices = @transform_2, window_bounds = array<i64: 8, 1>}, {transform_indices = @transform_3, window_bounds = array<i64: 1, 8, 144>}]} {
    %c0 = arith.constant 0 : index
    %c0_0 = arith.constant 0 : index
    %c0_1 = arith.constant 0 : index
    %0 = vector.load %arg2[%c0, %c0_0, %c0_1] : memref<1x8x144xf32, #tpu.memory_space<vmem>>, vector<1x8x144xf32>
    %1 = vector.shape_cast %0 : vector<1x8x144xf32> to vector<8x144xf32>
    %c0_2 = arith.constant 0 : index
    %c0_3 = arith.constant 0 : index
    %2 = vector.load %arg3[%c0_2, %c0_3] : memref<8x8xf32, #tpu.memory_space<vmem>>, vector<8x8xf32>
    %cst = arith.constant dense<0.000000e+00> : vector<8x144xf32>
    %3 = tpu.matmul %2, %1, %cst {dimension_numbers = #tpu.dot_dimension_numbers<[1], [0], [0], [1], [0, 0, 1, 1], [], []>} : vector<8x8xf32>, vector<8x144xf32>, vector<8x144xf32> -> vector<8x144xf32>
    %c0_4 = arith.constant 0 : index
    %c0_5 = arith.constant 0 : index
    %4 = vector.load %arg4[%c0_4, %c0_5] : memref<8x1xf32, #tpu.memory_space<vmem>>, vector<8x1xf32>
    %5 = vector.broadcast %4 : vector<8x1xf32> to vector<8x144xf32>
    %6 = arith.addf %3, %5 : vector<8x144xf32>
    %c0_6 = arith.constant 0 : index
    %c0_7 = arith.constant 0 : index
    %c0_8 = arith.constant 0 : index
    %7 = vector.load %arg5[%c0_6, %c0_7, %c0_8] : memref<1x8x144xf32, #tpu.memory_space<vmem>>, vector<1x8x144xf32>
    %8 = vector.shape_cast %7 : vector<1x8x144xf32> to vector<8x144xf32>
    %9 = vector.shape_cast %6 : vector<8x144xf32> to vector<1x8x144xf32>
    tpu.vector_store %arg5[%c0_6, %c0_7, %c0_8], %9 {strides = array<i32>} : memref<1x8x144xf32, #tpu.memory_space<vmem>>, vector<1x8x144xf32>,
    return
  }
  func.func @transform_0(%arg0: i32, %arg1: i32) -> (i32, i32, i32) {
    %c0_i32 = arith.constant 0 : i32
    %c0_i32_0 = arith.constant 0 : i32
    return %arg0, %c0_i32, %arg1 : i32, i32, i32
  }
  func.func @transform_1(%arg0: i32, %arg1: i32) -> (i32, i32) {
    %c0_i32 = arith.constant 0 : i32
    %c0_i32_0 = arith.constant 0 : i32
    %c0_i32_1 = arith.constant 0 : i32
    return %c0_i32, %c0_i32_0 : i32, i32
  }
  func.func @transform_2(%arg0: i32, %arg1: i32) -> (i32, i32) {
    %c0_i32 = arith.constant 0 : i32
    %c0_i32_0 = arith.constant 0 : i32
    %c0_i32_1 = arith.constant 0 : i32
    return %c0_i32, %c0_i32_0 : i32, i32
  }
  func.func @transform_3(%arg0: i32, %arg1: i32) -> (i32, i32, i32) {
    %c0_i32 = arith.constant 0 : i32
    %c0_i32_0 = arith.constant 0 : i32
    return %arg0, %c0_i32, %arg1 : i32, i32, i32
  }
}

</mosaic_0001>

<bundles_post_ra>
// kernel: reverse.0
= control target key start
LH: loop header
LB: loop body
LE: loop exit
PB: predicated region body
PF: predicated region fallthrough
CT: control target
= control target key end

     0   :  { %v72_v3 = vlaneseq  ;;  %v65_v6 = vld [vmem:[#allocation0 + $0x7] ss:$-1 sm:$0xff]  ;;  %v79_v8 = vld [vmem:[#allocation0 + $0x17] ss:$-1 sm:$0xff]  ;;  %s331_s0 = inlined_call_operand.vmem [shape: f32[2,4,16,7], index: 0, kind: input, shape index: {}]   ;;  %s332_s1 = inlined_call_operand.vmem [shape: f32[2,4,16,7], index: 1, kind: output, shape index: {}]  }
   0x1   :  { %v45_v0 = vld [vmem:[%s331_s0] sm:$0xff]  ;;  %v47_v1 = vld [vmem:[%s331_s0 + $0x8] sm:$0xff]  ;;  %v49_v2 = vld [vmem:[%s331_s0 + $0x10] sm:$0xff]  ;;  %v66_v12 = vrot.slane %v65_v6, 1  ;;  %v80_v13 = vrot.slane %v79_v8, 1 }
   0x2   :  { %46 = vst [vmem:[#allocation0 + $0x8] sm:$0xff] %v45_v0  ;;  %v51_v4 = vld [vmem:[%s331_s0 + $0x18] sm:$0xff]  ;;  %v53_v5 = vld [vmem:[%s331_s0 + $0x20] sm:$0xff]  ;;  %v55_v7 = vld [vmem:[%s331_s0 + $0x28] sm:$0xff]  ;;  %v73_v10 = vshrl.u32 %v72_v3, 7 }
   0x3   :  { %48 = vst [vmem:[#allocation0 + $0x18] sm:$0xff] %v47_v1  ;;  %v57_v9 = vld [vmem:[%s331_s0 + $0x30] sm:$0xff]  ;;  %v59_v11 = vld [vmem:[%s331_s0 + $0x38] sm:$0xff]  ;;  %v93_v14 = vld [vmem:[#allocation0 + $0x27] ss:$-1 sm:$0xff] }
   0x4   :  { %50 = vst [vmem:[#allocation0 + $0x28] sm:$0xff] %v49_v2  ;;  %vm74_vm0 = vcmp.lt.s32.totalorder %v73_v10, 7  ;;  %v107_v16 = vld [vmem:[#allocation0 + $0x37] ss:$-1 sm:$0xff]  ;;  %v94_v19 = vrot.slane %v93_v14, 1 }
   0x5   :  { %52 = vst [vmem:[#allocation0 + $0x38] sm:$0xff] %v51_v4  ;;  %v121_v22 = vld [vmem:[#allocation0 + $0x47] ss:$-1 sm:$0xff]  ;;  %v108_v24 = vrot.slane %v107_v16, 1  ;;  %v135_v28 = vld [vmem:[#allocation0 + $0x57] ss:$-1 sm:$0xff] }
   0x6   :  { %54 = vst [vmem:[#allocation0 + $0x48] sm:$0xff] %v53_v5  ;;  %v122_v29 = vrot.slane %v121_v22, 1  ;;  %v149_v32 = vld [vmem:[#allocation0 + $0x67] ss:$-1 sm:$0xff]  ;;  %v136_v33 = vrot.slane %v135_v28, 1 }
   0x7   :  { %56 = vst [vmem:[#allocation0 + $0x58] sm:$0xff] %v55_v7  ;;  %v163_v36 = vld [vmem:[#allocation0 + $0x77] ss:$-1 sm:$0xff]  ;;  %v150_v37 = vrot.slane %v149_v32, 1 }
   0x8   :  { %58 = vst [vmem:[#allocation0 + $0x68] sm:$0xff] %v57_v9  ;;  %v164_v40 = vrot.slane %v163_v36, 1 }
   0x9   :  { %60 = vst [vmem:[#allocation0 + $0x78] sm:$0xff] %v59_v11  ;;  %v70_v15 = vld [vmem:[#allocation0 + $0xf] ss:$-1 sm:$0xff] }
   0xa   :  { %67 = vst [vmem:[#allocation1] sm:$0xff] %v66_v12  ;;  %v71_v17 = vrot.slane %v70_v15, 1  ;;  %v84_v18 = vld [vmem:[#allocation0 + $0x1f] ss:$-1 sm:$0xff] }
   0xb   :  { %81 = vst [vmem:[#allocation1 + $0x8] sm:$0xff] %v80_v13  ;;  %v85_v20 = vrot.slane %v84_v18, 1  ;;  %v98_v21 = vld [vmem:[#allocation0 + $0x2f] ss:$-1 sm:$0xff] }
   0xc   :  { %75 = vst.msk [vmem:[#allocation1] sm:$0xff] %vm74_vm0, %v71_v17  ;;  %v99_v23 = vrot.slane %v98_v21, 1  ;;  %v112_v25 = vld [vmem:[#allocation0 + $0x3f] ss:$-1 sm:$0xff] }
   0xd   :  { %89 = vst.msk [vmem:[#allocation1 + $0x8] sm:$0xff] %vm74_vm0, %v85_v20  ;;  %v113_v26 = vrot.slane %v112_v25, 1  ;;  %v126_v27 = vld [vmem:[#allocation0 + $0x4f] ss:$-1 sm:$0xff] }
   0xe   :  { %95 = vst [vmem:[#allocation1 + $0x10] sm:$0xff] %v94_v19  ;;  %v140_v30 = vld [vmem:[#allocation0 + $0x5f] ss:$-1 sm:$0xff]  ;;  %v127_v31 = vrot.slane %v126_v27, 1 }
   0xf   :  { %103 = vst.msk [vmem:[#allocation1 + $0x10] sm:$0xff] %vm74_vm0, %v99_v23  ;;  %v154_v34 = vld [vmem:[#allocation0 + $0x6f] ss:$-1 sm:$0xff]  ;;  %v141_v35 = vrot.slane %v140_v30, 1 }
  0x10   :  { %109 = vst [vmem:[#allocation1 + $0x18] sm:$0xff] %v108_v24  ;;  %v168_v38 = vld [vmem:[#allocation0 + $0x7f] ss:$-1 sm:$0xff]  ;;  %v155_v39 = vrot.slane %v154_v34, 1 }
  0x11   :  { %117 = vst.msk [vmem:[#allocation1 + $0x18] sm:$0xff] %vm74_vm0, %v113_v26  ;;  %v169_v41 = vrot.slane %v168_v38, 1 }
  0x12   :  { %123 = vst [vmem:[#allocation1 + $0x20] sm:$0xff] %v122_v29 }
  0x13   :  { %131 = vst.msk [vmem:[#allocation1 + $0x20] sm:$0xff] %vm74_vm0, %v127_v31  ;;  %v216_v42 = vld [vmem:[#allocation1] sm:$0xff] }
  0x14   :  { %137 = vst [vmem:[#allocation1 + $0x28] sm:$0xff] %v136_v33  ;;  %v218_v43 = vld [vmem:[#allocation1 + $0x8] sm:$0xff] }
  0x15   :  { %145 = vst.msk [vmem:[#allocation1 + $0x28] sm:$0xff] %vm74_vm0, %v141_v35 }
  0x16   :  { %151 = vst [vmem:[#allocation1 + $0x30] sm:$0xff] %v150_v37  ;;  %v220_v44 = vld [vmem:[#allocation1 + $0x10] sm:$0xff] }
  0x17   :  { %159 = vst.msk [vmem:[#allocation1 + $0x30] sm:$0xff] %vm74_vm0, %v155_v39 }
  0x18   :  { %165 = vst [vmem:[#allocation1 + $0x38] sm:$0xff] %v164_v40  ;;  %v222_v45 = vld [vmem:[#allocation1 + $0x18] sm:$0xff] }
  0x19   :  { %173 = vst.msk [vmem:[#allocation1 + $0x38] sm:$0xff] %vm74_vm0, %v169_v41 }
  0x1a   :  { %217 = vst [vmem:[%s332_s1] sm:$0xff] %v216_v42  ;;  %v224_v46 = vld [vmem:[#allocation1 + $0x20] sm:$0xff] }
  0x1b   :  { %219 = vst [vmem:[%s332_s1 + $0x8] sm:$0xff] %v218_v43 }
  0x1c   :  { %221 = vst [vmem:[%s332_s1 + $0x10] sm:$0xff] %v220_v44  ;;  %v226_v47 = vld [vmem:[#allocation1 + $0x28] sm:$0xff] }
  0x1d   :  { %223 = vst [vmem:[%s332_s1 + $0x18] sm:$0xff] %v222_v45 }
  0x1e   :  { %225 = vst [vmem:[%s332_s1 + $0x20] sm:$0xff] %v224_v46  ;;  %v228_v48 = vld [vmem:[#allocation1 + $0x30] sm:$0xff] }
  0x1f   :  { %227 = vst [vmem:[%s332_s1 + $0x28] sm:$0xff] %v226_v47 }
  0x20   :  { %229 = vst [vmem:[%s332_s1 + $0x30] sm:$0xff] %v228_v48  ;;  %v230_v49 = vld [vmem:[#allocation1 + $0x38] sm:$0xff] }
  0x21   :  { %231 = vst [vmem:[%s332_s1 + $0x38] sm:$0xff] %v230_v49 }

// kernel: simplified_fourier_block.1
= control target key start
LH: loop header
LB: loop body
LE: loop exit
PB: predicated region body
PF: predicated region fallthrough
CT: control target
= control target key end

     0   :  { %s439_s12 = smov 0   ;;  %s441_s13 = smov 0   ;;  %s478_s0 = inlined_call_operand.vmem [shape: f32[2,8,144], index: 0, kind: input, shape index: {}]   ;;  %s479_s1 = inlined_call_operand.vmem [shape: f32[8,8], index: 1, kind: input, shape index: {}]   ;;  %s480_s2 = inlined_call_operand.vmem [shape: f32[8,1], index: 2, kind: input, shape index: {}]   ;;  %s481_s3 = inlined_call_operand.vmem [shape: f32[2,8,144], index: 3, kind: output, shape index: {}]  }
   0x1   :  { %s443_s14 = smov 0  }
   0x2 LB: > { %s25_s15 = sadd.s32 1, %s412_s13  ;;  %p357_p0 = scmp.ge.s32.totalorder %s416_s14, 1  ;;  %s416_s14 = sphi %s443_s14, %s13_s14   ;;  %s412_s13 = sphi %s441_s13, %s483_s13   ;;  %s408_s12 = sphi %s439_s12, %s482_s12  }
   0x3   : > { %p27_p1 = scmp.ge.s32.totalorder %s25_s15, 2  ;;  %p158_p2 = scmp.lt.s32.totalorder %s416_s14, 3 }
   0x5   : > { %s485_s15 = smov (%p27_p1, %s25_s15), 0  ;;  %p159_p3 = pnand %p357_p0, %p158_p2 }
   0x6   : > { %p191_p4 = scmp.lt.s32.totalorder (!%p159_p3), %s408_s12, 1 }
   0x7   : > { %162 = sbr.rel (%p159_p3) target bundleno = 147 (0x93), region = 32 }
   0xc   : > { %v213_v0 = vld [vmem:[%s480_s2] sm:$0xff]  ;;  %v418_v1 = vmov 0   ;;  %s487_s12 = smov (!%p191_p4, %s408_s12), 1  ;;  %vm219_vm0 = vcmask 64512   ;;  %vm264_vm1 = vcmask 130048  }
   0xd   : > { %393 = vset.pattern.permute.xlu0 %v418_v1  ;;  %s366_s18 = sshll.u32 %s487_s12, 4  ;;  %v212_v2 = vld [vmem:[%s479_s1] sm:$0xff] }
   0xe   : > { %216 = vperm.xlu0 %393, %v213_v0   ;;  %s198_s21 = scalar_lea.vmem %s478_s0, %s366_s18  ;;  %s208_s26 = scalar_lea.vmem %s481_s3, %s366_s18 }
   0xf   : > { %v210_v3 = vld [vmem:[%s198_s21] sm:$0xff]  ;;  %v211_v4 = vld [vmem:[%s198_s21 + $0x8] sm:$0xff] }
  0x10   : > { %238 = vmatpush.msra.mxu0 %v210_v3  ;;  %258 = vmatpush.msra.mxu1 %v211_v4 }
  0x11   : > { %362 = vmatmul.msk.f32.vlgmr.msra.gmra.mxu0 %vm219_vm0, %v212_v2  ;;  %363 = vmatmul.msk.f32.vlgmr.msra.gmra.mxu1 %vm219_vm0, %v212_v2 }
  0x80   : > { %v217_v5 = vpop.permute.xlu0 %216 }
  0x8e   : > { %v240_v6 = vpop.f32.mrf.mxu0  ;;  %v260_v7 = vpop.f32.mrf.mxu1 }
  0x8f   : > { %v241_v8 = vadd.f32 %v240_v6, %v217_v5  ;;  %v261_v9 = vadd.f32 %v260_v7, %v217_v5 }
  0x91   : > { %263 = vst [vmem:[%s208_s26] sm:$0xff] %v241_v8 }
  0x92   : > { %265 = vst.msk [vmem:[%s208_s26 + $0x8] sm:$0xff] %vm264_vm1, %v261_v9 }
  0x93 PF: > { %s13_s14 = sadd.s32 1, %s416_s14   ;;  %s482_s12 = smov %s412_s13 }
  0x94   : > { %p10_p5 = scmp.ge.s32.totalorder %s13_s14, 4   ;;  %s483_s13 = smov %s485_s15 }
  0x96   :  { %12 = sbr.rel (!%p10_p5) target bundleno = 2 (0x2), region = 62 }

</bundles_post_ra>
